<compile_context>
chip_gen: v6e
topology: v6e:2x2x1
jax: 0.10.0
libtpu: 0.0.40
codegen_flags: <defaults>
</compile_context>

<pallas_src>
import jax
import jax.numpy as jnp
from jax.experimental import pallas as pl
from jax.experimental.pallas import tpu as pltpu

IN_FEATURES = 784
HIDDEN = 256
OUT_FEATURES = 10

N_PAD = 128     # class dim padded to one full lane group (lane-dense store)
NEG_BIG = -1e30


def _round_up(x, m):
    return (x + m - 1) // m * m


def mlp_kernel(x_ref, w1_ref, b1_ref, w2_ref, b2_ref, o_ref):
    # hidden = sigmoid(x @ W1 + b1)     (TB, 784)bf16 @ (784, 256)bf16 -> f32
    x_b = x_ref[...].astype(jnp.bfloat16)
    h = jnp.dot(x_b, w1_ref[...], preferred_element_type=jnp.float32)
    h = jax.nn.sigmoid(h + b1_ref[...])                       # f32 VPU/EUP

    # logits = hidden @ W2 + b2         (TB, 256)bf16 @ (256, 128)bf16 -> f32
    logits = jnp.dot(h.astype(jnp.bfloat16), w2_ref[...],
                     preferred_element_type=jnp.float32)
    logits = logits + b2_ref[...]       # padded classes get -1e30 bias (f32)

    # numerically stable softmax over the (padded) class dim — all f32
    m = jnp.max(logits, axis=-1, keepdims=True)
    e = jnp.exp(logits - m)             # padded columns -> exp(-huge) = 0
    denom = jnp.sum(e, axis=-1, keepdims=True)
    inv = pl.reciprocal(denom, approx=True)     # EUP slot (nearly free)
    inv = inv * (2.0 - denom * inv)             # one Newton step -> f32 precision
    o_ref[...] = (e * inv).astype(o_ref.dtype)


def mlp_forward(x, w1, b1, w2, b2, *, tb_target=1024):
    """x: (B, 784) f32 (or bf16); w1: (784, 256); b1: (256,); w2: (256, 10);
    b2: (10,).  Returns (B, 10) softmax probabilities (f32)."""
    B, K = x.shape
    assert K == IN_FEATURES

    # Batch tile: multiple of 8 sublanes; no batch padding — the final partial
    # block is masked by Pallas and all computation is row-independent.
    TB = min(tb_target, _round_up(B, 8))
    # Keep >= 2 grid steps when the batch is big enough to split, so v7x's two
    # TensorCores both get work (harmless elsewhere).
    if B >= 512 and pl.cdiv(B, TB) < 2:
        TB = _round_up(pl.cdiv(B, 2), 8)
    grid = (pl.cdiv(B, TB),)

    # Weights: one-off bf16 cast (tiny). Class dim padded 10 -> 128 with zero
    # weight columns + -1e30 bias so padded logits add zero softmax mass.
    w1_b = jnp.asarray(w1, jnp.bfloat16)
    b1_p = jnp.asarray(b1, jnp.float32).reshape(1, HIDDEN)
    w2_b = (jnp.zeros((HIDDEN, N_PAD), jnp.bfloat16)
            .at[:, :OUT_FEATURES].set(jnp.asarray(w2, jnp.bfloat16)))
    b2_p = (jnp.full((1, N_PAD), NEG_BIG, jnp.float32)
            .at[0, :OUT_FEATURES].set(jnp.asarray(b2, jnp.float32).reshape(-1)))

    flops = 2 * B * (IN_FEATURES * HIDDEN + HIDDEN * N_PAD)
    transcendentals = B * (HIDDEN + N_PAD)
    bytes_accessed = (x.dtype.itemsize * B * IN_FEATURES
                      + 2 * IN_FEATURES * HIDDEN + 4 * HIDDEN
                      + 2 * HIDDEN * N_PAD + 4 * N_PAD
                      + 4 * B * N_PAD)

    out_padded = pl.pallas_call(
        mlp_kernel,
        out_shape=jax.ShapeDtypeStruct((B, N_PAD), jnp.float32),
        grid=grid,
        in_specs=[
            pl.BlockSpec((TB, IN_FEATURES), lambda i: (i, 0)),     # x tile (pipelined)
            pl.BlockSpec((IN_FEATURES, HIDDEN), lambda i: (0, 0)),  # W1 (resident)
            pl.BlockSpec((1, HIDDEN), lambda i: (0, 0)),           # b1 (resident)
            pl.BlockSpec((HIDDEN, N_PAD), lambda i: (0, 0)),       # W2 (resident)
            pl.BlockSpec((1, N_PAD), lambda i: (0, 0)),            # b2 (resident)
        ],
        out_specs=pl.BlockSpec((TB, N_PAD), lambda i: (i, 0)),
        compiler_params=pltpu.CompilerParams(
            dimension_semantics=("parallel",)),
        cost_estimate=pl.CostEstimate(
            flops=flops,
            transcendentals=transcendentals,
            bytes_accessed=bytes_accessed),
    )(x, w1_b, b1_p, w2_b, b2_p)

    return out_padded[:, :OUT_FEATURES]


def init_params(key):
    """Deterministic init matching PyTorch nn.Linear shapes.
    PyTorch stores weight as (out, in); we store the transpose (in, out)."""
    k1, k2, k3, k4 = jax.random.split(key, 4)
    lim1 = 1.0 / jnp.sqrt(jnp.float32(IN_FEATURES))
    lim2 = 1.0 / jnp.sqrt(jnp.float32(HIDDEN))
    w1 = jax.random.uniform(k1, (IN_FEATURES, HIDDEN), jnp.float32, -lim1, lim1)
    b1 = jax.random.uniform(k2, (HIDDEN,), jnp.float32, -lim1, lim1)
    w2 = jax.random.uniform(k3, (HIDDEN, OUT_FEATURES), jnp.float32, -lim2, lim2)
    b2 = jax.random.uniform(k4, (OUT_FEATURES,), jnp.float32, -lim2, lim2)
    return w1, b1, w2, b2


def reference_forward(x, w1, b1, w2, b2):
    h = jax.nn.sigmoid(x @ w1 + b1[None, :])
    logits = h @ w2 + b2[None, :]
    return jax.nn.softmax(logits, axis=1)


if __name__ == "__main__":
    key = jax.random.PRNGKey(0)
    kx, kp, kx2 = jax.random.split(key, 3)
    w1, b1, w2, b2 = init_params(kp)

    # Small case (matches the PyTorch module's MNIST-style input).
    B = 8
    x = jax.random.normal(kx, (B, IN_FEATURES), jnp.float32)
    out = jax.block_until_ready(mlp_forward(x, w1, b1, w2, b2))
    ref = reference_forward(x, w1, b1, w2, b2)
    assert out.shape == (B, OUT_FEATURES)
    assert jnp.allclose(jnp.sum(out, axis=1), 1.0, atol=1e-4)
    # bf16 MXU operands (f32 accumulation) -> compare at 2e-3 absolute.
    assert jnp.allclose(out, ref, atol=2e-3)

    # Non-multiple batch: exercises the cdiv grid and masked partial block.
    B2 = 300
    x2 = jax.random.normal(kx2, (B2, IN_FEATURES), jnp.float32)
    out2 = jax.block_until_ready(mlp_forward(x2, w1, b1, w2, b2))
    ref2 = reference_forward(x2, w1, b1, w2, b2)
    assert out2.shape == (B2, OUT_FEATURES)
    assert jnp.allclose(jnp.sum(out2, axis=1), 1.0, atol=1e-4)
    assert jnp.allclose(out2, ref2, atol=2e-3)

    print("KERNEL_OK")
</pallas_src>

<mosaic_0001>
module attributes {stable_mosaic.version = 11 : i64} {
  func.func @mlp_kernel(%arg0: i32, %arg1: memref<8x784xf32, #tpu.memory_space<vmem>>, %arg2: memref<784x256xbf16, #tpu.memory_space<vmem>>, %arg3: memref<1x256xf32, #tpu.memory_space<vmem>>, %arg4: memref<256x128xbf16, #tpu.memory_space<vmem>>, %arg5: memref<1x128xf32, #tpu.memory_space<vmem>>, %arg6: memref<8x128xf32, #tpu.memory_space<vmem>>) attributes {dimension_semantics = [#tpu.dimension_semantics<parallel>], iteration_bounds = array<i64: 1>, scalar_prefetch = 0 : i64, scratch_operands = 0 : i64, tpu.core_type = #tpu.core_type<tc>, window_params = [{transform_indices = @transform_0, window_bounds = array<i64: 8, 784>}, {pipeline_mode = #tpu.pipeline_mode<synchronous>, transform_indices = @transform_1, window_bounds = array<i64: 784, 256>}, {pipeline_mode = #tpu.pipeline_mode<synchronous>, transform_indices = @transform_2, window_bounds = array<i64: 1, 256>}, {pipeline_mode = #tpu.pipeline_mode<synchronous>, transform_indices = @transform_3, window_bounds = array<i64: 256, 128>}, {pipeline_mode = #tpu.pipeline_mode<synchronous>, transform_indices = @transform_4, window_bounds = array<i64: 1, 128>}, {transform_indices = @transform_5, window_bounds = array<i64: 8, 128>}]} {
    %c0 = arith.constant 0 : index
    %c0_0 = arith.constant 0 : index
    %0 = vector.load %arg1[%c0, %c0_0] : memref<8x784xf32, #tpu.memory_space<vmem>>, vector<8x784xf32>
    %1 = arith.truncf %0 : vector<8x784xf32> to vector<8x784xbf16>
    %c0_1 = arith.constant 0 : index
    %c0_2 = arith.constant 0 : index
    %2 = vector.load %arg2[%c0_1, %c0_2] : memref<784x256xbf16, #tpu.memory_space<vmem>>, vector<784x256xbf16>
    %cst = arith.constant dense<0.000000e+00> : vector<8x256xf32>
    %3 = tpu.matmul %1, %2, %cst {dimension_numbers = #tpu.dot_dimension_numbers<[1], [0], [0], [1], [0, 0, 1, 1], [], []>} : vector<8x784xbf16>, vector<784x256xbf16>, vector<8x256xf32> -> vector<8x256xf32>
    %c0_3 = arith.constant 0 : index
    %c0_4 = arith.constant 0 : index
    %4 = vector.load %arg3[%c0_3, %c0_4] : memref<1x256xf32, #tpu.memory_space<vmem>>, vector<1x256xf32>
    %5 = vector.broadcast %4 : vector<1x256xf32> to vector<8x256xf32>
    %6 = arith.addf %3, %5 : vector<8x256xf32>
    %7 = arith.negf %6 : vector<8x256xf32>
    %8 = math.exp %7 : vector<8x256xf32>
    %cst_5 = arith.constant 1.000000e+00 : f32
    %9 = vector.broadcast %cst_5 : f32 to vector<8x256xf32>
    %10 = arith.addf %9, %8 : vector<8x256xf32>
    %11 = arith.divf %9, %10 : vector<8x256xf32>
    %12 = arith.truncf %11 : vector<8x256xf32> to vector<8x256xbf16>
    %c0_6 = arith.constant 0 : index
    %c0_7 = arith.constant 0 : index
    %13 = vector.load %arg4[%c0_6, %c0_7] : memref<256x128xbf16, #tpu.memory_space<vmem>>, vector<256x128xbf16>
    %cst_8 = arith.constant dense<0.000000e+00> : vector<8x128xf32>
    %14 = tpu.matmul %12, %13, %cst_8 {dimension_numbers = #tpu.dot_dimension_numbers<[1], [0], [0], [1], [0, 0, 1, 1], [], []>} : vector<8x256xbf16>, vector<256x128xbf16>, vector<8x128xf32> -> vector<8x128xf32>
    %c0_9 = arith.constant 0 : index
    %c0_10 = arith.constant 0 : index
    %15 = vector.load %arg5[%c0_9, %c0_10] : memref<1x128xf32, #tpu.memory_space<vmem>>, vector<1x128xf32>
    %16 = vector.broadcast %15 : vector<1x128xf32> to vector<8x128xf32>
    %17 = arith.addf %14, %16 : vector<8x128xf32>
    %cst_11 = arith.constant dense<0xFF800000> : vector<8xf32>
    %18 = vector.multi_reduction <maximumf>, %17, %cst_11 [1] : vector<8x128xf32> to vector<8xf32>
    %19 = vector.shape_cast %18 : vector<8xf32> to vector<8x1xf32>
    %20 = vector.broadcast %19 : vector<8x1xf32> to vector<8x128xf32>
    %21 = arith.subf %17, %20 : vector<8x128xf32>
    %22 = math.exp %21 : vector<8x128xf32>
    %cst_12 = arith.constant dense<0.000000e+00> : vector<8xf32>
    %23 = vector.multi_reduction <add>, %22, %cst_12 [1] : vector<8x128xf32> to vector<8xf32>
    %24 = vector.shape_cast %23 : vector<8xf32> to vector<8x1xf32>
    %25 = tpu.reciprocal %24 {approx = true} : vector<8x1xf32> -> vector<8x1xf32>
    %26 = arith.mulf %24, %25 : vector<8x1xf32>
    %cst_13 = arith.constant 2.000000e+00 : f32
    %27 = vector.broadcast %cst_13 : f32 to vector<8x1xf32>
    %28 = arith.subf %27, %26 : vector<8x1xf32>
    %29 = arith.mulf %25, %28 : vector<8x1xf32>
    %30 = vector.broadcast %29 : vector<8x1xf32> to vector<8x128xf32>
    %31 = arith.mulf %22, %30 : vector<8x128xf32>
    %c0_14 = arith.constant 0 : index
    %c0_15 = arith.constant 0 : index
    %32 = vector.load %arg6[%c0_14, %c0_15] : memref<8x128xf32, #tpu.memory_space<vmem>>, vector<8x128xf32>
    tpu.vector_store %arg6[%c0_14, %c0_15], %31 {strides = array<i32>} : memref<8x128xf32, #tpu.memory_space<vmem>>, vector<8x128xf32>,
    return
  }
  func.func @transform_0(%arg0: i32) -> (i32, i32) {
    %c0_i32 = arith.constant 0 : i32
    %c0_i32_0 = arith.constant 0 : i32
    return %arg0, %c0_i32 : i32, i32
  }
  func.func @transform_1(%arg0: i32) -> (i32, i32) {
    %c0_i32 = arith.constant 0 : i32
    %c0_i32_0 = arith.constant 0 : i32
    %c0_i32_1 = arith.constant 0 : i32
    return %c0_i32, %c0_i32_0 : i32, i32
  }
  func.func @transform_2(%arg0: i32) -> (i32, i32) {
    %c0_i32 = arith.constant 0 : i32
    %c0_i32_0 = arith.constant 0 : i32
    %c0_i32_1 = arith.constant 0 : i32
    return %c0_i32, %c0_i32_0 : i32, i32
  }
  func.func @transform_3(%arg0: i32) -> (i32, i32) {
    %c0_i32 = arith.constant 0 : i32
    %c0_i32_0 = arith.constant 0 : i32
    %c0_i32_1 = arith.constant 0 : i32
    return %c0_i32, %c0_i32_0 : i32, i32
  }
  func.func @transform_4(%arg0: i32) -> (i32, i32) {
    %c0_i32 = arith.constant 0 : i32
    %c0_i32_0 = arith.constant 0 : i32
    %c0_i32_1 = arith.constant 0 : i32
    return %c0_i32, %c0_i32_0 : i32, i32
  }
  func.func @transform_5(%arg0: i32) -> (i32, i32) {
    %c0_i32 = arith.constant 0 : i32
    %c0_i32_0 = arith.constant 0 : i32
    return %arg0, %c0_i32 : i32, i32
  }
}

</mosaic_0001>

<bundles_post_ra>
// kernel: tpu_custom_call.1
= control target key start
LH: loop header
LB: loop body
LE: loop exit
PB: predicated region body
PF: predicated region fallthrough
CT: control target
= control target key end

     0   :  { %10 = vsyncpa [#allocation3], 0  ;;  %s1529_s0 = inlined_call_operand.hbm [shape: f32[8,784], index: 0, kind: input, shape index: {}]   ;;  %s1530_s1 = inlined_call_operand.hbm [shape: bf16[784,256], index: 1, kind: input, shape index: {}]   ;;  %s1531_s2 = inlined_call_operand.vmem [shape: f32[1,256], index: 2, kind: input, shape index: {}]   ;;  %s1532_s3 = inlined_call_operand.hbm [shape: bf16[256,128], index: 3, kind: input, shape index: {}]   ;;  %s1533_s4 = inlined_call_operand.vmem [shape: f32[1,128], index: 4, kind: input, shape index: {}]   ;;  %s1534_s5 = inlined_call_operand.hbm [shape: f32[8,128], index: 5, kind: output, shape index: {}]  }
   0x1   :  { %11 = vsyncpa [#allocation6], 0 }
   0x2   :  { %12 = vsyncpa [#allocation4], 0  ;;  %s1471_s18 = smov [#allocation5]  }
   0x3   :  { %s28_s19 = sshll.u32 %s1471_s18, 4  ;;  %s29_s19 = int_to_ptr.vmem [resolvable:$true] %s28_s19 }
   0x4   :  { %s1393_s20 = scalar_lea.vmem %s29_s19, 12544  ;;  %p1398_p1 = scmp.lt.s32.totalorder %s29_s19, %s29_s19 }
   0x5   :  { %p1394_p0 = scmp.ne.s32.totalorder %s29_s19, %s1393_s20  ;;  %p1399_p2 = scmp.lt.s32.totalorder %s1393_s20, %s1393_s20 }
   0x7   :  { %p1400_p3 = por %p1399_p2, %p1398_p1 }
   0x9   :  { %p1401_p4 = pnand %p1400_p3, %p1394_p0 }
   0xb   :  { %1404 = shalt.err (!%p1401_p4)
}
   0xc   :  { %s1472_s21 = smov 128   ;;  %s1473_s22 = smov 8  }
   0xd   :  { %34 = dma.hbm_to_vmem [thread:$0]  %s1530_s1, 12544, %s29_s19, [#allocation6], %s1472_s21, %s1472_s21, %s1473_s22  }
   0xe   :  { %s1474_s25 = smov [#allocation2]   ;;  %s1475_s27 = smov [#allocation7]  }
   0xf   :  { %s19_s26 = sshll.u32 %s1474_s25, 4  ;;  %s42_s28 = sshll.u32 %s1475_s27, 4  ;;  %s20_s26 = int_to_ptr.vmem [resolvable:$true] %s19_s26  ;;  %s43_s28 = int_to_ptr.vmem [resolvable:$true] %s42_s28 }
  0x10   :  { %s1413_s29 = scalar_lea.vmem %s20_s26, 896  ;;  %p1418_p6 = scmp.lt.s32.totalorder %s20_s26, %s20_s26 }
  0x11   :  { %p1414_p5 = scmp.ne.s32.totalorder %s20_s26, %s1413_s29  ;;  %p1419_p7 = scmp.lt.s32.totalorder %s1413_s29, %s1413_s29 }
  0x13   :  { %p1420_p8 = por %p1419_p7, %p1418_p6 }
  0x15   :  { %p1421_p9 = pnand %p1420_p8, %p1414_p5 }
  0x17   :  { %1424 = shalt.err (!%p1421_p9)
}
  0x18   :  { %22 = dma.hbm_to_vmem [thread:$0]  %s1529_s0, 896, %s20_s26, [#allocation3]  }
  0x19   :  { %s1433_s7 = scalar_lea.vmem %s43_s28, 2048  ;;  %p1438_p11 = scmp.lt.s32.totalorder %s43_s28, %s43_s28 }
  0x1a   :  { %p1434_p10 = scmp.ne.s32.totalorder %s43_s28, %s1433_s7  ;;  %p1439_p12 = scmp.lt.s32.totalorder %s1433_s7, %s1433_s7 }
  0x1c   :  { %p1440_p13 = por %p1439_p12, %p1438_p11 }
  0x1e   :  { %p1441_p0 = pnand %p1440_p13, %p1434_p10 }
  0x20   :  { %1444 = shalt.err (!%p1441_p0)
}
  0x21   :  { %s1476_s1 = smov 64   ;;  %s1477_s8 = smov 4  }
  0x22   :  { %48 = dma.hbm_to_vmem [thread:$0]  %s1532_s3, 2048, %s43_s28, [#allocation6], %s1476_s1, %s1476_s1, %s1477_s8  }
  0x23   :  { %1465 = dma.done.wait [#allocation3], 896  }
  0x24   :  { %1466 = vsyncadd [#allocation3], 4294966400 }
  0x25   :  { %1467 = dma.done.wait [#allocation6], 14592  }
  0x26   :  { %1468 = vsyncadd [#allocation6], 4294952704  ;;  %v1210_v0 = vld [vmem:[#allocation5 + $0x74] ss:$8 sps:$4 sm:$0xff]   ;;  %v1212_v1 = vld [vmem:[#allocation5 + $0x70] ss:$8 sps:$4 sm:$0xff]  }
  0x27   :  { %679 = vmatprep.subr.bf16.mxu0 %v1210_v0  ;;  %v1213_v2 = vld [vmem:[#allocation5 + $0x174] ss:$8 sps:$4 sm:$0xff]   ;;  %v1215_v3 = vld [vmem:[#allocation5 + $0x170] ss:$8 sps:$4 sm:$0xff]   ;;  %v1216_v4 = vld [vmem:[#allocation5 + $0x64] ss:$8 sps:$4 sm:$0xff]  }
  0x28   :  { %680 = vmatpush1.bf16.msra.mxu0 %v1212_v1  ;;  %v1218_v5 = vld [vmem:[#allocation5 + $0x60] ss:$8 sps:$4 sm:$0xff]   ;;  %720 = vmatprep.subr.bf16.mxu1 %v1213_v2  ;;  %v1219_v6 = vld [vmem:[#allocation5 + $0x164] ss:$8 sps:$4 sm:$0xff]   ;;  %v1222_v8 = vld [vmem:[#allocation5 + $0x54] ss:$8 sps:$4 sm:$0xff]  }
  0x29   :  { %721 = vmatpush1.bf16.msra.mxu1 %v1215_v3  ;;  %681 = vmatprep.subr.bf16.mxu0 %v1216_v4  ;;  %v1221_v7 = vld [vmem:[#allocation5 + $0x160] ss:$8 sps:$4 sm:$0xff]   ;;  %v1224_v9 = vld [vmem:[#allocation5 + $0x50] ss:$8 sps:$4 sm:$0xff]   ;;  %v1225_v10 = vld [vmem:[#allocation5 + $0x154] ss:$8 sps:$4 sm:$0xff]  }
  0x2a   :  { %722 = vmatprep.subr.bf16.mxu1 %v1219_v6  ;;  %v1228_v11 = vld [vmem:[#allocation5 + $0x44] ss:$8 sps:$4 sm:$0xff]   ;;  %v1227_v12 = vld [vmem:[#allocation5 + $0x150] ss:$8 sps:$4 sm:$0xff]   ;;  %v1230_v14 = vld [vmem:[#allocation5 + $0x40] ss:$8 sps:$4 sm:$0xff]  }
  0x2b   :  { %v1231_v13 = vld [vmem:[#allocation5 + $0x144] ss:$8 sps:$4 sm:$0xff]   ;;  %v1234_v15 = vld [vmem:[#allocation5 + $0x34] ss:$8 sps:$4 sm:$0xff]   ;;  %v1233_v16 = vld [vmem:[#allocation5 + $0x140] ss:$8 sps:$4 sm:$0xff]  }
  0x2c   :  { %682 = vmatpush1.bf16.msra.mxu0 %v1218_v5  ;;  %v1237_v17 = vld [vmem:[#allocation5 + $0x134] ss:$8 sps:$4 sm:$0xff]   ;;  %v1236_v18 = vld [vmem:[#allocation5 + $0x30] ss:$8 sps:$4 sm:$0xff]   ;;  %v1240_v19 = vld [vmem:[#allocation5 + $0x24] ss:$8 sps:$4 sm:$0xff]  }
  0x2d   :  { %683 = vmatprep.subr.bf16.mxu0 %v1222_v8  ;;  %723 = vmatpush1.bf16.msra.mxu1 %v1221_v7  ;;  %v1239_v20 = vld [vmem:[#allocation5 + $0x130] ss:$8 sps:$4 sm:$0xff]   ;;  %v1243_v21 = vld [vmem:[#allocation5 + $0x124] ss:$8 sps:$4 sm:$0xff]   ;;  %v1242_v22 = vld [vmem:[#allocation5 + $0x20] ss:$8 sps:$4 sm:$0xff]  }
  0x2e   :  { %724 = vmatprep.subr.bf16.mxu1 %v1225_v10  ;;  %v1246_v23 = vld [vmem:[#allocation5 + $0x14] ss:$8 sps:$4 sm:$0xff]   ;;  %v1245_v24 = vld [vmem:[#allocation5 + $0x120] ss:$8 sps:$4 sm:$0xff]   ;;  %v1248_v26 = vld [vmem:[#allocation5 + $0x10] ss:$8 sps:$4 sm:$0xff]  }
  0x2f   :  { %v1249_v25 = vld [vmem:[#allocation5 + $0x114] ss:$8 sps:$4 sm:$0xff]   ;;  %v1252_v27 = vld [vmem:[#allocation5 + $0x4] ss:$8 sps:$4 sm:$0xff]   ;;  %v1251_v28 = vld [vmem:[#allocation5 + $0x110] ss:$8 sps:$4 sm:$0xff]  }
  0x30   :  { %684 = vmatpush1.bf16.msra.mxu0 %v1224_v9  ;;  %v1255_v29 = vld [vmem:[#allocation5 + $0x104] ss:$8 sps:$4 sm:$0xff]   ;;  %v1254_v30 = vld [vmem:[#allocation5] ss:$8 sps:$4 sm:$0xff]   ;;  %v1258_v31 = vld [vmem:[#allocation5 + $0xf4] ss:$8 sps:$4 sm:$0xff]  }
  0x31   :  { %685 = vmatprep.subr.bf16.mxu0 %v1228_v11  ;;  %725 = vmatpush1.bf16.msra.mxu1 %v1227_v12  ;;  %v1257_v32 = vld [vmem:[#allocation5 + $0x100] ss:$8 sps:$4 sm:$0xff]   ;;  %v1261_v33 = vld [vmem:[#allocation5 + $0x1f4] ss:$8 sps:$4 sm:$0xff]   ;;  %v1260_v34 = vld [vmem:[#allocation5 + $0xf0] ss:$8 sps:$4 sm:$0xff]  }
  0x32   :  { %726 = vmatprep.subr.bf16.mxu1 %v1231_v13  ;;  %v1264_v35 = vld [vmem:[#allocation5 + $0xe4] ss:$8 sps:$4 sm:$0xff]   ;;  %v1263_v36 = vld [vmem:[#allocation5 + $0x1f0] ss:$8 sps:$4 sm:$0xff]   ;;  %v1266_v38 = vld [vmem:[#allocation5 + $0xe0] ss:$8 sps:$4 sm:$0xff]  }
  0x33   :  { %v1267_v37 = vld [vmem:[#allocation5 + $0x1e4] ss:$8 sps:$4 sm:$0xff]   ;;  %v1270_v39 = vld [vmem:[#allocation5 + $0xd4] ss:$8 sps:$4 sm:$0xff]   ;;  %v1269_v40 = vld [vmem:[#allocation5 + $0x1e0] ss:$8 sps:$4 sm:$0xff]  }
  0x34   :  { %686 = vmatpush1.bf16.msra.mxu0 %v1230_v14  ;;  %v1273_v41 = vld [vmem:[#allocation5 + $0x1d4] ss:$8 sps:$4 sm:$0xff]   ;;  %v1272_v42 = vld [vmem:[#allocation5 + $0xd0] ss:$8 sps:$4 sm:$0xff]   ;;  %v1276_v43 = vld [vmem:[#allocation5 + $0xc4] ss:$8 sps:$4 sm:$0xff]  }
  0x35   :  { %687 = vmatprep.subr.bf16.mxu0 %v1234_v15  ;;  %727 = vmatpush1.bf16.msra.mxu1 %v1233_v16  ;;  %v1275_v44 = vld [vmem:[#allocation5 + $0x1d0] ss:$8 sps:$4 sm:$0xff]   ;;  %v1279_v45 = vld [vmem:[#allocation5 + $0x1c4] ss:$8 sps:$4 sm:$0xff]   ;;  %v1278_v47 = vld [vmem:[#allocation5 + $0xc0] ss:$8 sps:$4 sm:$0xff]  }
  0x36   :  { %728 = vmatprep.subr.bf16.mxu1 %v1237_v17  ;;  %v62_v46 = vld [vmem:[#allocation2 + $0x8] sm:$0xff]  ;;  %v64_v50 = vld [vmem:[#allocation2 + $0x18] sm:$0xff]  ;;  %v61_v4 = vld [vmem:[#allocation2] sm:$0xff]  ;;  %vm675_vm0 = vcmask 130048   ;;  %s1479_s12 = smov [#allocation8]  }
  0x37   :  { %v69_v48 = vpack.c.bf16 %v62_v46, %v62_v46  ;;  %v1282_v49 = vld [vmem:[#allocation5 + $0xb4] ss:$8 sps:$4 sm:$0xff]   ;;  %v1281_v51 = vld [vmem:[#allocation5 + $0x1c0] ss:$8 sps:$4 sm:$0xff]   ;;  %v71_v52 = vpack.c.bf16 %v64_v50, %v64_v50  ;;  %v1284_v54 = vld [vmem:[#allocation5 + $0xb0] ss:$8 sps:$4 sm:$0xff]   ;;  %v68_v7 = vpack.c.bf16 %v61_v4, %v61_v4 }
  0x38   :  { %688 = vmatpush1.bf16.msra.mxu0 %v1236_v18  ;;  %v1285_v53 = vld [vmem:[#allocation5 + $0x1b4] ss:$8 sps:$4 sm:$0xff]   ;;  %v1288_v55 = vld [vmem:[#allocation5 + $0xa4] ss:$8 sps:$4 sm:$0xff]   ;;  %v1287_v56 = vld [vmem:[#allocation5 + $0x1b0] ss:$8 sps:$4 sm:$0xff]  }
  0x39   :  { %689 = vmatprep.subr.bf16.mxu0 %v1240_v19  ;;  %729 = vmatpush1.bf16.msra.mxu1 %v1239_v20  ;;  %v1291_v57 = vld [vmem:[#allocation5 + $0x1a4] ss:$8 sps:$4 sm:$0xff]   ;;  %v1290_v58 = vld [vmem:[#allocation5 + $0xa0] ss:$8 sps:$4 sm:$0xff]   ;;  %v1294_v59 = vld [vmem:[#allocation5 + $0x94] ss:$8 sps:$4 sm:$0xff]  }
  0x3a   :  { %730 = vmatprep.subr.bf16.mxu1 %v1243_v21  ;;  %711 = vmatprep.mubr.bf16.mxu0 %v69_v48  ;;  %v1293_v60 = vld [vmem:[#allocation5 + $0x1a0] ss:$8 sps:$4 sm:$0xff]   ;;  %v1297_v61 = vld [vmem:[#allocation5 + $0x194] ss:$8 sps:$4 sm:$0xff]   ;;  %v1296_v62 = vld [vmem:[#allocation5 + $0x90] ss:$8 sps:$4 sm:$0xff]  }
  0x3b   :  { %752 = vmatprep.mubr.bf16.mxu1 %v71_v52  ;;  %v1300_v63 = vld [vmem:[#allocation5 + $0x84] ss:$8 sps:$4 sm:$0xff]   ;;  %v1299_v0 = vld [vmem:[#allocation5 + $0x190] ss:$8 sps:$4 sm:$0xff]   ;;  %v1302_v1 = vld [vmem:[#allocation5 + $0x80] ss:$8 sps:$4 sm:$0xff]  }
  0x3c   :  { %690 = vmatpush1.bf16.msra.mxu0 %v1242_v22  ;;  %v1303_v2 = vld [vmem:[#allocation5 + $0x184] ss:$8 sps:$4 sm:$0xff]   ;;  %v1305_v3 = vld [vmem:[#allocation5 + $0x180] ss:$8 sps:$4 sm:$0xff]   ;;  %v1308_v5 = vld [vmem:[#allocation5 + $0x274] ss:$8 sps:$4 sm:$0xff]  }
  0x3d   :  { %691 = vmatprep.subr.bf16.mxu0 %v1246_v23  ;;  %731 = vmatpush1.bf16.msra.mxu1 %v1245_v24  ;;  %v63_v6 = vld [vmem:[#allocation2 + $0x10] sm:$0xff]  ;;  %v1311_v9 = vld [vmem:[#allocation5 + $0x264] ss:$8 sps:$4 sm:$0xff]   ;;  %v1351_v11 = vld [vmem:[#allocation5 + $0x300] ss:$8 sps:$4 sm:$0xff]   ;;  %v1478_v19 = vmov 0  }
  0x3e   :  { %732 = vmatprep.subr.bf16.mxu1 %v1249_v25  ;;  %v1306_v8 = vld [vmem:[#allocation5 + $0x270] ss:$8 sps:$4 sm:$0xff]   ;;  %v70_v10 = vpack.c.bf16 %v63_v6, %v63_v6  ;;  %v1353_v12 = vld [vmem:[#allocation5 + $0x304] ss:$8 sps:$4 sm:$0xff]   ;;  %v1309_v13 = vld [vmem:[#allocation5 + $0x260] ss:$8 sps:$4 sm:$0xff]  }
  0x3f   :  { %v1314_v14 = vld [vmem:[#allocation5 + $0x254] ss:$8 sps:$4 sm:$0xff]   ;;  %v1312_v18 = vld [vmem:[#allocation5 + $0x250] ss:$8 sps:$4 sm:$0xff]   ;;  %v1317_v20 = vld [vmem:[#allocation5 + $0x244] ss:$8 sps:$4 sm:$0xff]  }
  0x40   :  { %692 = vmatpush1.bf16.msra.mxu0 %v1248_v26  ;;  %v67_v15 = vld [vmem:[#allocation2 + $0x30] sm:$0xff]  ;;  %v66_v16 = vld [vmem:[#allocation2 + $0x28] sm:$0xff]  ;;  %v1315_v22 = vld [vmem:[#allocation5 + $0x240] ss:$8 sps:$4 sm:$0xff]   ;;  %s1051_s13 = sshll.u32 %s1479_s12, 4  ;;  %s1052_s13 = int_to_ptr.vmem [resolvable:$true] %s1051_s13 }
  0x41   :  { %693 = vmatprep.subr.bf16.mxu0 %v1252_v27  ;;  %733 = vmatpush1.bf16.msra.mxu1 %v1251_v28  ;;  %v73_v17 = vpack.c.bf16 %v66_v16, %v66_v16  ;;  %v74_v21 = vpack.c.bf16 %v67_v15, %v67_v15  ;;  %v1320_v23 = vld [vmem:[#allocation5 + $0x234] ss:$8 sps:$4 sm:$0xff]   ;;  %v1318_v24 = vld [vmem:[#allocation5 + $0x230] ss:$8 sps:$4 sm:$0xff]   ;;  %v1323_v25 = vld [vmem:[#allocation5 + $0x224] ss:$8 sps:$4 sm:$0xff]   ;;  %p1450_p2 = scmp.lt.s32.totalorder %s1052_s13, %s1052_s13 }
  0x42   :  { %734 = vmatprep.subr.bf16.mxu1 %v1255_v29  ;;  %v1321_v26 = vld [vmem:[#allocation5 + $0x220] ss:$8 sps:$4 sm:$0xff]   ;;  %v1326_v27 = vld [vmem:[#allocation5 + $0x214] ss:$8 sps:$4 sm:$0xff]   ;;  %v1324_v28 = vld [vmem:[#allocation5 + $0x210] ss:$8 sps:$4 sm:$0xff]  }
  0x43   :  { %v1329_v29 = vld [vmem:[#allocation5 + $0x204] ss:$8 sps:$4 sm:$0xff]   ;;  %v1354_v46 = vld [vmem:[#allocation5 + $0x280] ss:$8 sps:$4 sm:$0xff]  }
  0x44   :  { %694 = vmatpush1.bf16.msra.mxu0 %v1254_v30  ;;  %v1327_v30 = vld [vmem:[#allocation5 + $0x200] ss:$8 sps:$4 sm:$0xff]  }
  0x45   :  { %695 = vmatprep.subr.bf16.mxu0 %v1258_v31  ;;  %735 = vmatpush1.bf16.msra.mxu1 %v1257_v32  ;;  %v1332_v31 = vld [vmem:[#allocation5 + $0x2f4] ss:$8 sps:$4 sm:$0xff]   ;;  %v1330_v32 = vld [vmem:[#allocation5 + $0x2f0] ss:$8 sps:$4 sm:$0xff]   ;;  %v1358_v50 = vld [vmem:[#allocation7 + $0x38] sm:$0xff]  }
  0x46   :  { %736 = vmatprep.subr.bf16.mxu1 %v1261_v33  ;;  %v1335_v33 = vld [vmem:[#allocation5 + $0x2e4] ss:$8 sps:$4 sm:$0xff]   ;;  %v173_v16 = vld [vmem:[%s1531_s2] sm:$0x3] }
  0x47   :  { %v1360_v52 = vld [vmem:[#allocation7 + $0x30] sm:$0xff]  }
  0x48   :  { %696 = vmatpush2.bf16.msra.mxu0 %v1260_v34  ;;  %v1333_v34 = vld [vmem:[#allocation5 + $0x2e0] ss:$8 sps:$4 sm:$0xff]  }
  0x49   :  { %697 = vmatprep.subr.bf16.mxu0 %v1264_v35  ;;  %737 = vmatpush2.bf16.msra.mxu1 %v1263_v36  ;;  %v1338_v35 = vld [vmem:[#allocation5 + $0x2d4] ss:$8 sps:$4 sm:$0xff]   ;;  %v1336_v36 = vld [vmem:[#allocation5 + $0x2d0] ss:$8 sps:$4 sm:$0xff]  }
  0x4a   :  { %738 = vmatprep.subr.bf16.mxu1 %v1267_v37  ;;  %v1341_v37 = vld [vmem:[#allocation5 + $0x2c4] ss:$8 sps:$4 sm:$0xff]  }
  0x4c   :  { %698 = vmatpush2.bf16.msra.mxu0 %v1266_v38  ;;  %v1339_v38 = vld [vmem:[#allocation5 + $0x2c0] ss:$8 sps:$4 sm:$0xff]  }
  0x4d   :  { %699 = vmatprep.subr.bf16.mxu0 %v1270_v39  ;;  %739 = vmatpush2.bf16.msra.mxu1 %v1269_v40  ;;  %v1344_v39 = vld [vmem:[#allocation5 + $0x2b4] ss:$8 sps:$4 sm:$0xff]   ;;  %v1342_v40 = vld [vmem:[#allocation5 + $0x2b0] ss:$8 sps:$4 sm:$0xff]  }
  0x4e   :  { %740 = vmatprep.subr.bf16.mxu1 %v1273_v41  ;;  %v1347_v41 = vld [vmem:[#allocation5 + $0x2a4] ss:$8 sps:$4 sm:$0xff]  }
  0x50   :  { %700 = vmatpush2.bf16.msra.mxu0 %v1272_v42  ;;  %v1345_v42 = vld [vmem:[#allocation5 + $0x2a0] ss:$8 sps:$4 sm:$0xff]  }
  0x51   :  { %701 = vmatprep.subr.bf16.mxu0 %v1276_v43  ;;  %741 = vmatpush2.bf16.msra.mxu1 %v1275_v44  ;;  %v1350_v43 = vld [vmem:[#allocation5 + $0x294] ss:$8 sps:$4 sm:$0xff]   ;;  %v1348_v44 = vld [vmem:[#allocation5 + $0x290] ss:$8 sps:$4 sm:$0xff]  }
  0x52   :  { %742 = vmatprep.subr.bf16.mxu1 %v1279_v45  ;;  %v1356_v45 = vld [vmem:[#allocation5 + $0x284] ss:$8 sps:$4 sm:$0xff]  }
  0x54   :  { %702 = vmatpush2.bf16.msra.mxu0 %v1278_v47  ;;  %v65_v47 = vld [vmem:[#allocation2 + $0x20] sm:$0xff] }
  0x55   :  { %703 = vmatprep.subr.bf16.mxu0 %v1282_v49  ;;  %743 = vmatpush2.bf16.msra.mxu1 %v1281_v51  ;;  %v72_v48 = vpack.c.bf16 %v65_v47, %v65_v47  ;;  %v1357_v49 = vld [vmem:[#allocation7 + $0x78] sm:$0xff]   ;;  %v1359_v51 = vld [vmem:[#allocation7 + $0x70] sm:$0xff]  }
  0x56   :  { %744 = vmatprep.subr.bf16.mxu1 %v1285_v53  ;;  %v1361_v53 = vld [vmem:[#allocation7 + $0x68] sm:$0xff]  }
  0x58   :  { %704 = vmatpush2.bf16.msra.mxu0 %v1284_v54  ;;  %v1362_v54 = vld [vmem:[#allocation7 + $0x28] sm:$0xff]  }
  0x59   :  { %705 = vmatprep.subr.bf16.mxu0 %v1288_v55  ;;  %745 = vmatpush2.bf16.msra.mxu1 %v1287_v56  ;;  %v1363_v55 = vld [vmem:[#allocation7 + $0x60] sm:$0xff]  }
  0x5a   :  { %746 = vmatprep.subr.bf16.mxu1 %v1291_v57  ;;  %v1364_v56 = vld [vmem:[#allocation7 + $0x20] sm:$0xff]   ;;  %v1365_v57 = vld [vmem:[#allocation7 + $0x58] sm:$0xff]  }
  0x5c   :  { %706 = vmatpush2.bf16.msra.mxu0 %v1290_v58  ;;  %v1366_v58 = vld [vmem:[#allocation7 + $0x18] sm:$0xff]  }
  0x5d   :  { %707 = vmatprep.subr.bf16.mxu0 %v1294_v59  ;;  %747 = vmatpush2.bf16.msra.mxu1 %v1293_v60  ;;  %v1367_v59 = vld [vmem:[#allocation7 + $0x50] sm:$0xff]  }
  0x5e   :  { %748 = vmatprep.subr.bf16.mxu1 %v1297_v61  ;;  %v1368_v60 = vld [vmem:[#allocation7 + $0x10] sm:$0xff]   ;;  %v1369_v61 = vld [vmem:[#allocation7 + $0x48] sm:$0xff]  }
  0x60   :  { %708 = vmatpush2.bf16.msra.mxu0 %v1296_v62  ;;  %v1370_v62 = vld [vmem:[#allocation7 + $0x8] sm:$0xff]  }
  0x61   :  { %709 = vmatprep.subr.bf16.mxu0 %v1300_v63  ;;  %749 = vmatpush2.bf16.msra.mxu1 %v1299_v0  ;;  %v1371_v63 = vld [vmem:[#allocation7 + $0x40] sm:$0xff]  }
  0x62   :  { %750 = vmatprep.subr.bf16.mxu1 %v1303_v2  ;;  %v1372_v0 = vld [vmem:[#allocation7] sm:$0xff]  }
  0x64   :  { %710 = vmatpush2.bf16.msra.mxu0 %v1302_v1 }
  0x65   :  { %761 = vmatprep.subr.bf16.mxu0 %v1308_v5  ;;  %751 = vmatpush2.bf16.msra.mxu1 %v1305_v3 }
  0x66   :  { %816 = vmatprep.subr.bf16.mxu1 %v1353_v12 }
  0x67   :  { %712 = vmatmul.mubr.bf16.vlgmr.msra.gmra.mxu0 %v68_v7 }
  0x68   :  { %762 = vmatpush1.bf16.msra.mxu0 %v1306_v8  ;;  %753 = vmatmul.mubr.bf16.vlgmr.msra.gmra.mxu1 %v70_v10 }
  0x69   :  { %763 = vmatprep.subr.bf16.mxu0 %v1311_v9  ;;  %817 = vmatpush1.bf16.msra.mxu1 %v1351_v11 }
  0x6a   :  { %834 = vmatprep.mubr.bf16.mxu1 %v1478_v19  ;;  %793 = vmatprep.mubr.bf16.mxu0 %v73_v17 }
  0x6b   :  { %1179 = vmatprep.subr.bf16.mxu1 %v1357_v49 }
  0x6c   :  { %764 = vmatpush1.bf16.msra.mxu0 %v1309_v13  ;;  %v175_v13 = vlaneseq }
  0x6d   :  { %765 = vmatprep.subr.bf16.mxu0 %v1314_v14 }
  0x6e   :  { %v176_v14 = vshrl.u32 %v175_v13, 7 }
  0x70   :  { %766 = vmatpush1.bf16.msra.mxu0 %v1312_v18  ;;  %1159 = vmatmul.mubr.msk.bf16.vlgmr.msra.gmra.mxu1 %vm675_vm0, %v74_v21  ;;  %v177_v15 = vsub.s32 0, %v176_v14  ;;  %v181_v17 = vsub.s32 1, %v176_v14 }
  0x71   :  { %767 = vmatprep.subr.bf16.mxu0 %v1317_v20  ;;  %1180 = vmatpush3.bf16.msra.mxu1 %v1358_v50 }
  0x72   :  { %1181 = vmatprep.subr.bf16.mxu1 %v1359_v51  ;;  %v178_v18 = vrot.slane %v173_v16, %v177_v15  ;;  %v182_v19 = vrot.slane %v173_v16, %v181_v17 }
  0x74   :  { %768 = vmatpush1.bf16.msra.mxu0 %v1315_v22 }
  0x75   :  { %769 = vmatprep.subr.bf16.mxu0 %v1320_v23  ;;  %1182 = vmatpush3.bf16.msra.mxu1 %v1360_v52 }
  0x76   :  { %1183 = vmatprep.subr.bf16.mxu1 %v1361_v53 }
  0x78   :  { %770 = vmatpush1.bf16.msra.mxu0 %v1318_v24 }
  0x79   :  { %771 = vmatprep.subr.bf16.mxu0 %v1323_v25  ;;  %1184 = vmatpush3.bf16.msra.mxu1 %v1362_v54 }
  0x7a   :  { %1185 = vmatprep.subr.bf16.mxu1 %v1363_v55 }
  0x7c   :  { %772 = vmatpush1.bf16.msra.mxu0 %v1321_v26 }
  0x7d   :  { %773 = vmatprep.subr.bf16.mxu0 %v1326_v27  ;;  %1186 = vmatpush3.bf16.msra.mxu1 %v1364_v56 }
  0x7e   :  { %1187 = vmatprep.subr.bf16.mxu1 %v1365_v57 }
  0x80   :  { %774 = vmatpush1.bf16.msra.mxu0 %v1324_v28 }
  0x81   :  { %775 = vmatprep.subr.bf16.mxu0 %v1329_v29  ;;  %1188 = vmatpush3.bf16.msra.mxu1 %v1366_v58 }
  0x82   :  { %1189 = vmatprep.subr.bf16.mxu1 %v1367_v59 }
  0x84   :  { %776 = vmatpush1.bf16.msra.mxu0 %v1327_v30 }
  0x85   :  { %777 = vmatprep.subr.bf16.mxu0 %v1332_v31  ;;  %1190 = vmatpush3.bf16.msra.mxu1 %v1368_v60 }
  0x86   :  { %1191 = vmatprep.subr.bf16.mxu1 %v1369_v61 }
  0x88   :  { %778 = vmatpush2.bf16.msra.mxu0 %v1330_v32 }
  0x89   :  { %779 = vmatprep.subr.bf16.mxu0 %v1335_v33  ;;  %1192 = vmatpush3.bf16.msra.mxu1 %v1370_v62 }
  0x8a   :  { %1193 = vmatprep.subr.bf16.mxu1 %v1371_v63 }
  0x8c   :  { %780 = vmatpush2.bf16.msra.mxu0 %v1333_v34 }
  0x8d   :  { %781 = vmatprep.subr.bf16.mxu0 %v1338_v35  ;;  %1194 = vmatpush3.bf16.msra.mxu1 %v1372_v0 }
  0x90   :  { %782 = vmatpush2.bf16.msra.mxu0 %v1336_v36 }
  0x91   :  { %783 = vmatprep.subr.bf16.mxu0 %v1341_v37 }
  0x94   :  { %784 = vmatpush2.bf16.msra.mxu0 %v1339_v38 }
  0x95   :  { %785 = vmatprep.subr.bf16.mxu0 %v1344_v39 }
  0x98   :  { %786 = vmatpush2.bf16.msra.mxu0 %v1342_v40 }
  0x99   :  { %787 = vmatprep.subr.bf16.mxu0 %v1347_v41 }
  0x9c   :  { %788 = vmatpush2.bf16.msra.mxu0 %v1345_v42 }
  0x9d   :  { %789 = vmatprep.subr.bf16.mxu0 %v1350_v43 }
  0xa0   :  { %790 = vmatpush2.bf16.msra.mxu0 %v1348_v44  ;;  %v1162_v44 = vld [vmem:[%s1533_s4] ss:$0 sm:$0xff]  ;;  %s1445_s4 = scalar_lea.vmem %s1052_s13, 128 }
  0xa1   :  { %791 = vmatprep.subr.bf16.mxu0 %v1356_v45  ;;  %p1446_p1 = scmp.ne.s32.totalorder %s1052_s13, %s1445_s4  ;;  %p1451_p3 = scmp.lt.s32.totalorder %s1445_s4, %s1445_s4 }
  0xa3   :  { %p1452_p4 = por %p1451_p3, %p1450_p2 }
  0xa4   :  { %792 = vmatpush2.bf16.msra.mxu0 %v1354_v46 }
  0xa5   :  { %p1453_p5 = pnand %p1452_p4, %p1446_p1 }
  0xa7   :  { %794 = vmatmul.mubr.bf16.vlgmr.msra.gmra.mxu0 %v72_v48 }
 0x127   :  { %v713_v1 = vpop.f32.mrf.mxu0 }
 0x128   :  { %v754_v3 = vpop.f32.mrf.mxu1  ;;  %v714_v20 = vadd.f32 %v713_v1, %v178_v18 }
 0x129   :  { %v715_v2 = vpop.f32.mrf.mxu0 }
 0x12a   :  { %v756_v5 = vpop.f32.mrf.mxu1  ;;  %v716_v21 = vadd.f32 %v715_v2, %v182_v19  ;;  %v755_v22 = vadd.f32 %v754_v3, %v714_v20 }
 0x12b   :  { %v717_v4 = vpop.f32.mrf.mxu0 }
 0x12c   :  { %v758_v7 = vpop.f32.mrf.mxu1  ;;  %v757_v24 = vadd.f32 %v756_v5, %v716_v21 }
 0x12d   :  { %v718_v6 = vpop.f32.mrf.mxu0 }
 0x12e   :  { %v759_v8 = vpop.f32.mrf.mxu1 }
 0x130   :  { %v836_v9 = vpop.f32.mrf.mxu1 }
 0x132   :  { %v838_v10 = vpop.f32.mrf.mxu1 }
 0x134   :  { %v840_v11 = vpop.f32.mrf.mxu1 }
 0x136   :  { %v841_v12 = vpop.f32.mrf.mxu1 }
 0x167   :  { %v795_v23 = vpop.f32.mrf.mxu0 }
 0x168   :  { %v796_v25 = vadd.f32 %v795_v23, %v755_v22 }
 0x169   :  { %v797_v26 = vpop.f32.mrf.mxu0 }
 0x16a   :  { %v837_v27 = vadd.f32 %v836_v9, %v796_v25  ;;  %v798_v28 = vadd.f32 %v797_v26, %v757_v24 }
 0x16b   :  { %v799_v29 = vpop.f32.mrf.mxu0 }
 0x16c   :  { %v1160_v30 = vmul.f32 -1.442695, %v837_v27  ;;  %v839_v31 = vadd.f32 %v838_v10, %v798_v28 }
 0x16d   :  { %v800_v32 = vpop.f32.mrf.mxu0 }
 0x16e   :  { %1373 = vpow2.f32 %v1160_v30  ;;  %v1161_v33 = vmul.f32 -1.442695, %v839_v31 }
 0x170   :  { %1375 = vpow2.f32 %v1161_v33 }
 0x17b   :  { %v1374_v34 = vpop.eup %1373 }
 0x17c   :  { %v849_v35 = vadd.f32 1.0, %v1374_v34 }
 0x17d   :  { %v1376_v36 = vpop.eup %1375 }
 0x17e   :  { %v850_v37 = vadd.f32 1.0, %v1376_v36  ;;  %1377 = vrcp.f32 %v849_v35 }
 0x180   :  { %1379 = vrcp.f32 %v850_v37 }
 0x18b   :  { %v1378_v38 = vpop.eup %1377 }
 0x18c   :  { %v855_v41 = vpack.c.bf16 %v1378_v38, %v1378_v38 }
 0x18d   :  { %v1380_v39 = vpop.eup %1379 }
 0x18e   :  { %v856_v40 = vpack.c.bf16 %v1380_v39, %v1380_v39 }
 0x190   :  { %1024 = vmatprep.mubr.bf16.mxu1 %v856_v40 }
 0x191   :  { %1025 = vmatmul.mubr.bf16.vlgmr.msra.gmra.mxu1 %v855_v41 }
 0x251   :  { %v1195_v42 = vpop.f32.mrf.mxu1 }
 0x253   :  { %v1196_v43 = vpop.f32.mrf.mxu1 }
 0x254   :  { %v1197_v45 = vadd.f32 %v1196_v43, %v1195_v42 }
 0x255   :  { %v1198_v46 = vpop.f32.mrf.mxu1 }
 0x256   :  { %v1027_v47 = vadd.f32 %v1197_v45, %v1162_v44 }
 0x257   :  { %v1199_v48 = vpop.f32.mrf.mxu1 }
 0x258   :  { %1032 = vmax.xlane.f32.xlu0 %v1027_v47 }
 0x2e1   :  { %v1033_v49 = vpop.xlane.xlu0 %1032 }
 0x2e2   :  { %v1034_v50 = vsub.f32 %v1027_v47, %v1033_v49 }
 0x2e4   :  { %v1035_v51 = vmul.f32 1.442695, %v1034_v50 }
 0x2e6   :  { %1381 = vpow2.f32 %v1035_v51 }
 0x2f3   :  { %v1382_v52 = vpop.eup %1381 }
 0x2f4   :  { %1037 = vadd.xlane.f32.xlu0 %v1382_v52 }
 0x37d   :  { %v1038_v53 = vpop.xlane.xlu0 %1037 }
 0x37e   :  { %1383 = vrcp.f32 %v1038_v53 }
 0x38b   :  { %v1384_v54 = vpop.eup %1383 }
 0x38c   :  { %v1040_v55 = vmul.f32 %v1384_v54, %v1038_v53 }
 0x38e   :  { %v1041_v56 = vsub.f32 2.0, %v1040_v55 }
 0x390   :  { %v1042_v57 = vmul.f32 %v1384_v54, %v1041_v56 }
 0x392   :  { %v1043_v58 = vmul.f32 %v1382_v52, %v1042_v57 }
 0x394   :  { %1044 = vst [vmem:[#allocation8] sm:$0xff] %v1043_v58 }
 0x395   :  { %1456 = shalt.err (!%p1453_p5)
}
 0x396   :  { %1054 = dma.vmem_to_hbm [thread:$0]  %s1052_s13, 128, %s1534_s5, [#allocation4]  }
 0x397   :  { %1469 = dma.done.wait [#allocation4], 128  }
 0x398   :  { %1470 = vsyncadd [#allocation4], 4294967168 }
 0x399   :  { %1058 = vsyncpa [#allocation3], 1 }
 0x39a   :  { %1059 = vsyncpa [#allocation6], 1 }
 0x39b   :  { %1060 = vsyncpa [#allocation4], 1 }

</bundles_post_ra>
